<compile_context>
chip_gen: v7x
topology: tpu7x:2x2x1
jax: 0.10.0
libtpu: 0.0.40
codegen_flags: <defaults>
</compile_context>

<pallas_src>
import numpy as np

import jax
import jax.numpy as jnp
from jax.experimental import pallas as pl
from jax.experimental.pallas import tpu as pltpu


def _build_avg_matrix(seq_len, kernel_size, dtype):
    """(L, L) matrix A such that (A @ x)[l] is the edge-replicated moving
    average of x at time l (AvgPool1d(stride=1) with replication padding)."""
    pad = (kernel_size - 1) // 2
    rows = np.arange(seq_len)
    counts = np.zeros((seq_len, seq_len), dtype=np.float64)
    for d in range(-pad, pad + 1):
        cols = np.clip(rows + d, 0, seq_len - 1)
        np.add.at(counts, (rows, cols), 1.0)  # edge rows accumulate clamped taps
    return jnp.asarray(counts / float(kernel_size), dtype=dtype)


def _pick_lane_block(total_lanes, max_lanes):
    """Largest multiple-of-128 block that divides `total_lanes` (itself a
    multiple of 128) and stays <= max_lanes (so all tiles are uniform and
    every store is a full, unmasked vst)."""
    q = total_lanes // 128
    max_q = max(1, max_lanes // 128)
    best = 1
    for m in range(1, min(q, max_q) + 1):
        if q % m == 0:
            best = m
    return best * 128


def _decomp_kernel(a_ref, x_ref, mean_ref, res_ref):
    # a_ref   : (L, L)   averaging matrix, resident in VMEM (constant index_map)
    # x_ref   : (L, TN)  input tile (time on sublanes, lanes fully dense)
    # mean_ref: (L, TN)  moving-average output tile
    # res_ref : (L, TN)  residual output tile
    x = x_ref[...]
    mean_f32 = jnp.dot(a_ref[...], x, preferred_element_type=jnp.float32)
    mean_out = mean_f32.astype(mean_ref.dtype)
    mean_ref[...] = mean_out
    res_ref[...] = (x - mean_out).astype(res_ref.dtype)


def series_decomp(x, kernel_size):
    """x: (B, L, C) float array. Returns (moving_mean, residual), both (B, L, C)."""
    B, L, C = x.shape
    # Edge-replication + AvgPool1d(stride=1) preserves the time length (needed
    # for the residual subtraction) only for odd kernel sizes.
    assert kernel_size % 2 == 1, "series_decomp requires an odd kernel_size"

    dtype = x.dtype
    itemsize = jnp.dtype(dtype).itemsize

    # Match A's dtype to the input: bf16 x bf16 -> f32 runs at native MXU rate.
    a_mat = _build_avg_matrix(L, kernel_size, dtype)
    a_bytes = L * L * itemsize

    # Generation-aware lane-block width: keep the pipelined working set
    # (x + mean + res, double-buffered, plus double-buffered A) inside the
    # smallest default scoped-VMEM budget (v5e: 16 MiB). Cap at 1024 lanes.
    per_lane_bytes = 6 * L * itemsize  # 3 arrays x 2 pipeline buffers per lane
    tile_budget = max((14 << 20) - 2 * a_bytes, 6 * L * 128 * itemsize)
    max_lanes = min(1024, max(128, (tile_budget // per_lane_bytes) // 128 * 128))

    if C % 128 == 0:
        # Channels already lane-aligned: tile (batch, channel-block) directly —
        # no wrapper transposes, x read once / outputs written once.
        block_n = _pick_lane_block(C, max_lanes)
        grid = (B, C // block_n)
        in_specs = [
            pl.BlockSpec((L, L), lambda b, c: (0, 0)),            # resident A
            pl.BlockSpec((None, L, block_n), lambda b, c: (b, 0, c)),
        ]
        out_spec = pl.BlockSpec((None, L, block_n), lambda b, c: (b, 0, c))
        out_shape = jax.ShapeDtypeStruct((B, L, C), dtype)
        dim_sem = ("parallel", "parallel")
        kern_in = x
        flops = 2 * B * L * L * C + B * L * C
        bytes_accessed = (3 * B * L * C + L * L) * itemsize
    else:
        # Small / unaligned channel count (typical DLinear): flatten time-major
        # so batch*channel sits on the lane axis -> unmasked 128-wide stores,
        # full MXU column utilization, few fat grid steps.
        n = B * C
        n_padded = -(-n // 128) * 128
        block_n = _pick_lane_block(n_padded, max_lanes)
        xt = jnp.transpose(x, (1, 0, 2)).reshape(L, n)
        if n_padded != n:
            xt = jnp.pad(xt, ((0, 0), (0, n_padded - n)))
        grid = (n_padded // block_n,)
        in_specs = [
            pl.BlockSpec((L, L), lambda j: (0, 0)),               # resident A
            pl.BlockSpec((L, block_n), lambda j: (0, j)),
        ]
        out_spec = pl.BlockSpec((L, block_n), lambda j: (0, j))
        out_shape = jax.ShapeDtypeStruct((L, n_padded), dtype)
        dim_sem = ("parallel",)
        kern_in = xt
        flops = 2 * L * L * n_padded + L * n_padded
        bytes_accessed = (3 * L * n_padded + L * L) * itemsize

    # Explicit scoped-VMEM limit: at least the (generous) defaults, never above
    # v7x's 64 MiB physical VMEM.
    vmem_limit = int(
        min(max(2 * a_bytes + per_lane_bytes * block_n + (4 << 20), 32 << 20), 64 << 20)
    )

    mean, res = pl.pallas_call(
        _decomp_kernel,
        out_shape=(out_shape, out_shape),
        grid_spec=pltpu.PrefetchScalarGridSpec(
            num_scalar_prefetch=0,
            grid=grid,
            in_specs=in_specs,
            out_specs=[out_spec, out_spec],
        ),
        compiler_params=pltpu.CompilerParams(
            dimension_semantics=dim_sem,
            vmem_limit_bytes=vmem_limit,
        ),
        cost_estimate=pl.CostEstimate(
            flops=flops, transcendentals=0, bytes_accessed=bytes_accessed
        ),
    )(a_mat, kern_in)

    if C % 128 != 0:
        mean = mean[:, : B * C].reshape(L, B, C).transpose(1, 0, 2)
        res = res[:, : B * C].reshape(L, B, C).transpose(1, 0, 2)
    return mean, res


def series_decomp_ref(x, kernel_size):
    """Pure-JAX reference mirroring the PyTorch module."""
    pad = (kernel_size - 1) // 2
    front = jnp.repeat(x[:, 0:1, :], pad, axis=1)
    end = jnp.repeat(x[:, -1:, :], pad, axis=1)
    xpad = jnp.concatenate([front, x, end], axis=1)
    L = x.shape[1]
    windows = jnp.stack(
        [xpad[:, t : t + L, :] for t in range(kernel_size)], axis=0
    )
    mean = jnp.mean(windows.astype(jnp.float32), axis=0).astype(x.dtype)
    return mean, x - mean


if __name__ == "__main__":
    k0, k1 = jax.random.split(jax.random.PRNGKey(0))

    # DLinear-style small-channel config -> exercises the flattened lane-dense path.
    B, L, C = 2, 96, 8
    kernel_size = 25
    x = jax.random.normal(k0, (B, L, C), dtype=jnp.float32)
    mean, res = series_decomp(x, kernel_size)
    jax.block_until_ready((mean, res))
    mean_ref, res_ref = series_decomp_ref(x, kernel_size)
    assert mean.shape == (B, L, C) and res.shape == (B, L, C)
    assert jnp.allclose(mean, mean_ref, atol=1e-5, rtol=1e-5)
    assert jnp.allclose(res, res_ref, atol=1e-5, rtol=1e-5)
    assert jnp.allclose(mean + res, x, atol=1e-6, rtol=1e-6)

    # Lane-aligned channel config -> exercises the direct (no layout plumbing) path.
    B2, L2, C2 = 2, 48, 128
    x2 = jax.random.normal(k1, (B2, L2, C2), dtype=jnp.float32)
    mean2, res2 = series_decomp(x2, 7)
    jax.block_until_ready((mean2, res2))
    mean2_ref, res2_ref = series_decomp_ref(x2, 7)
    assert jnp.allclose(mean2, mean2_ref, atol=1e-5, rtol=1e-5)
    assert jnp.allclose(res2, res2_ref, atol=1e-5, rtol=1e-5)

    print("KERNEL_OK")
</pallas_src>

<mosaic_0001>
module attributes {stable_mosaic.version = 11 : i64} {
  func.func @_decomp_kernel(%arg0: i32, %arg1: memref<96x96xf32, #tpu.memory_space<vmem>>, %arg2: memref<96x128xf32, #tpu.memory_space<vmem>>, %arg3: memref<96x128xf32, #tpu.memory_space<vmem>>, %arg4: memref<96x128xf32, #tpu.memory_space<vmem>>) attributes {dimension_semantics = [#tpu.dimension_semantics<parallel>], iteration_bounds = array<i64: 1>, scalar_prefetch = 0 : i64, scratch_operands = 0 : i64, tpu.core_type = #tpu.core_type<tc>, window_params = [{pipeline_mode = #tpu.pipeline_mode<synchronous>, transform_indices = @transform_0, window_bounds = array<i64: 96, 96>}, {transform_indices = @transform_1, window_bounds = array<i64: 96, 128>}, {transform_indices = @transform_2, window_bounds = array<i64: 96, 128>}, {transform_indices = @transform_3, window_bounds = array<i64: 96, 128>}]} {
    %c0 = arith.constant 0 : index
    %c0_0 = arith.constant 0 : index
    %0 = vector.load %arg2[%c0, %c0_0] : memref<96x128xf32, #tpu.memory_space<vmem>>, vector<96x128xf32>
    %c0_1 = arith.constant 0 : index
    %c0_2 = arith.constant 0 : index
    %1 = vector.load %arg1[%c0_1, %c0_2] : memref<96x96xf32, #tpu.memory_space<vmem>>, vector<96x96xf32>
    %cst = arith.constant dense<0.000000e+00> : vector<96x128xf32>
    %2 = tpu.matmul %1, %0, %cst {dimension_numbers = #tpu.dot_dimension_numbers<[1], [0], [0], [1], [0, 0, 1, 1], [], []>} : vector<96x96xf32>, vector<96x128xf32>, vector<96x128xf32> -> vector<96x128xf32>
    %c0_3 = arith.constant 0 : index
    %c0_4 = arith.constant 0 : index
    %3 = vector.load %arg3[%c0_3, %c0_4] : memref<96x128xf32, #tpu.memory_space<vmem>>, vector<96x128xf32>
    tpu.vector_store %arg3[%c0_3, %c0_4], %2 {strides = array<i32>} : memref<96x128xf32, #tpu.memory_space<vmem>>, vector<96x128xf32>,
    %4 = arith.subf %0, %2 : vector<96x128xf32>
    %c0_5 = arith.constant 0 : index
    %c0_6 = arith.constant 0 : index
    %5 = vector.load %arg4[%c0_5, %c0_6] : memref<96x128xf32, #tpu.memory_space<vmem>>, vector<96x128xf32>
    tpu.vector_store %arg4[%c0_5, %c0_6], %4 {strides = array<i32>} : memref<96x128xf32, #tpu.memory_space<vmem>>, vector<96x128xf32>,
    return
  }
  func.func @transform_0(%arg0: i32) -> (i32, i32) {
    %c0_i32 = arith.constant 0 : i32
    %c0_i32_0 = arith.constant 0 : i32
    %c0_i32_1 = arith.constant 0 : i32
    return %c0_i32, %c0_i32_0 : i32, i32
  }
  func.func @transform_1(%arg0: i32) -> (i32, i32) {
    %c0_i32 = arith.constant 0 : i32
    %c0_i32_0 = arith.constant 0 : i32
    return %c0_i32, %arg0 : i32, i32
  }
  func.func @transform_2(%arg0: i32) -> (i32, i32) {
    %c0_i32 = arith.constant 0 : i32
    %c0_i32_0 = arith.constant 0 : i32
    return %c0_i32, %arg0 : i32, i32
  }
  func.func @transform_3(%arg0: i32) -> (i32, i32) {
    %c0_i32 = arith.constant 0 : i32
    %c0_i32_0 = arith.constant 0 : i32
    return %c0_i32, %arg0 : i32, i32
  }
}

</mosaic_0001>

<bundles_post_ra>
// kernel: tpu_custom_call.1
= control target key start
LH: loop header
LB: loop body
LE: loop exit
PB: predicated region body
PF: predicated region fallthrough
CT: control target
= control target key end

     0   :  { %9 = vsyncpa [#allocation3], 0  ;;  %s671_s0 = inlined_call_operand.hbm [shape: f32[96,96], index: 0, kind: input, shape index: {}]   ;;  %s672_s1 = inlined_call_operand.hbm [shape: f32[96,128], index: 1, kind: input, shape index: {}]   ;;  %s673_s2 = inlined_call_operand.hbm [shape: f32[96,128], index: 2, kind: output, shape index: {0}]   ;;  %s674_s3 = inlined_call_operand.hbm [shape: f32[96,128], index: 3, kind: output, shape index: {1}]  }
   0x1   :  { %10 = vsyncpa [#allocation6], 0 }
   0x2   :  { %11 = vsyncpa [#allocation4], 0 }
   0x3   :  { %12 = vsyncpa [#allocation9], 0  ;;  %s515_s12 = smov [#allocation2]   ;;  %s419_s16 = scalar_lea.hbm %s671_s0, 1536 }
   0x4   :  { %s18_s13 = sshll.u32 %s515_s12, 4  ;;  %p420_p0 = scmp.ne.s32.totalorder %s671_s0, %s419_s16  ;;  %s19_s13 = int_to_ptr.vmem [resolvable:$true] %s18_s13 }
   0x5   :  { %p423_p1 = scmp.lt.u32.totalorder %s419_s16, %s671_s0 }
   0x7   :  { %p425_p2 = pnand %p423_p1, %p420_p0 }
   0x9   :  { %428 = shalt.err (!%p425_p2)
}
   0xa   :  { %s429_s21 = scalar_lea.vmem %s19_s13, 1536  ;;  %p434_p4 = scmp.lt.s32.totalorder %s19_s13, %s19_s13 }
   0xb   :  { %p430_p3 = scmp.ne.s32.totalorder %s19_s13, %s429_s21  ;;  %p435_p5 = scmp.lt.s32.totalorder %s429_s21, %s429_s21 }
   0xd   :  { %p436_p6 = por %p435_p5, %p434_p4 }
   0xf   :  { %p437_p7 = pnand %p436_p6, %p430_p3 }
  0x11   :  { %440 = shalt.err (!%p437_p7)
}
  0x12   :  { %s516_s22 = smov 128   ;;  %s517_s23 = smov 8  }
  0x13   :  { %24 = dma.hbm_to_vmem [thread:$0]  %s671_s0, 1536, %s19_s13, [#allocation3], %s516_s22, %s516_s22, %s517_s23  }
  0x14   :  { %s518_s26 = smov [#allocation5]   ;;  %s441_s30 = scalar_lea.hbm %s672_s1, 1536 }
  0x15   :  { %s30_s27 = sshll.u32 %s518_s26, 4  ;;  %p442_p8 = scmp.ne.s32.totalorder %s672_s1, %s441_s30  ;;  %s31_s27 = int_to_ptr.vmem [resolvable:$true] %s30_s27 }
  0x16   :  { %p445_p9 = scmp.lt.u32.totalorder %s441_s30, %s672_s1 }
  0x18   :  { %p447_p10 = pnand %p445_p9, %p442_p8 }
  0x1a   :  { %450 = shalt.err (!%p447_p10)
}
  0x1b   :  { %s451_s8 = scalar_lea.vmem %s31_s27, 1536  ;;  %p456_p12 = scmp.lt.s32.totalorder %s31_s27, %s31_s27 }
  0x1c   :  { %p452_p11 = scmp.ne.s32.totalorder %s31_s27, %s451_s8  ;;  %p457_p13 = scmp.lt.s32.totalorder %s451_s8, %s451_s8 }
  0x1e   :  { %p458_p0 = por %p457_p13, %p456_p12 }
  0x20   :  { %p459_p1 = pnand %p458_p0, %p452_p11 }
  0x22   :  { %462 = shalt.err (!%p459_p1)
}
  0x23   :  { %36 = dma.hbm_to_vmem [thread:$0]  %s672_s1, 1536, %s31_s27, [#allocation6], %s516_s22, %s516_s22, %s517_s23  }
  0x24   :  { %507 = dma.done.wait [#allocation3], 1536  }
  0x25   :  { %508 = vsyncadd [#allocation3], 4294965760 }
  0x26   :  { %509 = dma.done.wait [#allocation6], 1536  }
  0x27   :  { %510 = vsyncadd [#allocation6], 4294965760  ;;  %v571_v0 = vld [vmem:[#allocation5] sm:$0xff]  ;;  %v573_v1 = vld [vmem:[#allocation5 + $0x8] sm:$0xff]  ;;  %vm67_vm0 = vcmask 785408   ;;  %s519_s1 = smov [#allocation7]  }
  0x28   :  { %v575_v2 = vld [vmem:[#allocation5 + $0x10] sm:$0xff]  ;;  %v377_v3 = vpack.c.bf16 %v573_v1, %v571_v0  ;;  %v579_v4 = vld [vmem:[#allocation5 + $0x18] sm:$0xff]  ;;  %v583_v6 = vld [vmem:[#allocation5 + $0x20] sm:$0xff]  ;;  %s270_s10 = sshll.u32 %s519_s1, 4  ;;  %s520_s11 = smov [#allocation8]   ;;  %s623_s10 = int_to_ptr.vmem [resolvable:$true] %s270_s10 }
  0x29   :  { %v381_v5 = vpack.c.bf16 %v579_v4, %v575_v2  ;;  %v585_v7 = vld [vmem:[#allocation5 + $0x28] sm:$0xff]  ;;  %v55_v8 = vld [vmem:[#allocation2] sm:$0xff]  ;;  %v61_v9 = vld [vmem:[#allocation2 + $0x30] sm:$0xff]  ;;  %s282_s12 = sshll.u32 %s520_s11, 4  ;;  %s463_s13 = scalar_lea.vmem %s623_s10, 1536  ;;  %s629_s12 = int_to_ptr.vmem [resolvable:$true] %s282_s12 }
  0x2a   :  { %378 = vmatprep.subr.bf16.mxu0 %v377_v3  ;;  %401 = vmatprep.subr.bf16.mxu1 %v377_v3  ;;  %v385_v10 = vpack.c.bf16 %v585_v7, %v583_v6  ;;  %v589_v11 = vld [vmem:[#allocation5 + $0x30] sm:$0xff]  ;;  %v50_v12 = vld [vmem:[#allocation5 + $0x38] sm:$0xff]  ;;  %v594_v14 = vld [vmem:[#allocation5 + $0x40] sm:$0xff]  ;;  %p464_p2 = scmp.ne.s32.totalorder %s623_s10, %s463_s13  ;;  %p468_p3 = scmp.lt.s32.totalorder %s623_s10, %s623_s10 }
  0x2b   :  { %380 = vmatpush3.bf16.msra.mxu0 %v377_v3  ;;  %407 = vmatpush3.bf16.msra.mxu1 %v377_v3  ;;  %v389_v13 = vpack.c.bf16 %v50_v12, %v589_v11  ;;  %v596_v15 = vld [vmem:[#allocation5 + $0x48] sm:$0xff]  ;;  %v600_v17 = vld [vmem:[#allocation5 + $0x50] sm:$0xff]  ;;  %v602_v18 = vld [vmem:[#allocation5 + $0x58] sm:$0xff]  ;;  %p469_p4 = scmp.lt.s32.totalorder %s463_s13, %s463_s13 }
  0x2c   :  { %382 = vmatprep.subr.bf16.mxu0 %v381_v5  ;;  %402 = vmatprep.subr.bf16.mxu1 %v381_v5  ;;  %v393_v16 = vpack.c.bf16 %v596_v15, %v594_v14  ;;  %v397_v19 = vpack.c.bf16 %v602_v18, %v600_v17  ;;  %v56_v20 = vld [vmem:[#allocation2 + $0x8] sm:$0xff]  ;;  %v62_v21 = vld [vmem:[#allocation2 + $0x38] sm:$0xff]  ;;  %v57_v22 = vld [vmem:[#allocation2 + $0x10] sm:$0xff] }
  0x2d   :  { %359 = vmatprep.mubr.msk.f32.mxu0 %vm67_vm0, %v55_v8  ;;  %368 = vmatprep.mubr.msk.f32.mxu1 %vm67_vm0, %v61_v9  ;;  %v63_v23 = vld [vmem:[#allocation2 + $0x40] sm:$0xff]  ;;  %v58_v24 = vld [vmem:[#allocation2 + $0x18] sm:$0xff]  ;;  %v64_v25 = vld [vmem:[#allocation2 + $0x48] sm:$0xff]  ;;  %p470_p5 = por %p469_p4, %p468_p3 }
  0x2e   :  { %v59_v26 = vld [vmem:[#allocation2 + $0x20] sm:$0xff]  ;;  %v65_v27 = vld [vmem:[#allocation2 + $0x50] sm:$0xff]  ;;  %v60_v28 = vld [vmem:[#allocation2 + $0x28] sm:$0xff] }
  0x2f   :  { %384 = vmatpush3.bf16.msra.mxu0 %v381_v5  ;;  %408 = vmatpush3.bf16.msra.mxu1 %v381_v5  ;;  %v66_v29 = vld [vmem:[#allocation2 + $0x58] sm:$0xff]  ;;  %p471_p6 = pnand %p470_p5, %p464_p2 }
  0x30   :  { %386 = vmatprep.subr.bf16.mxu0 %v385_v10  ;;  %403 = vmatprep.subr.bf16.mxu1 %v385_v10 }
  0x33   :  { %388 = vmatpush3.bf16.msra.mxu0 %v385_v10  ;;  %409 = vmatpush3.bf16.msra.mxu1 %v385_v10 }
  0x34   :  { %390 = vmatprep.subr.bf16.mxu0 %v389_v13  ;;  %404 = vmatprep.subr.bf16.mxu1 %v389_v13 }
  0x37   :  { %392 = vmatpush3.bf16.msra.mxu0 %v389_v13  ;;  %410 = vmatpush3.bf16.msra.mxu1 %v389_v13 }
  0x38   :  { %394 = vmatprep.subr.bf16.mxu0 %v393_v16  ;;  %405 = vmatprep.subr.bf16.mxu1 %v393_v16 }
  0x3b   :  { %396 = vmatpush3.bf16.msra.mxu0 %v393_v16  ;;  %411 = vmatpush3.bf16.msra.mxu1 %v393_v16 }
  0x3c   :  { %398 = vmatprep.subr.bf16.mxu0 %v397_v19  ;;  %406 = vmatprep.subr.bf16.mxu1 %v397_v19 }
  0x3f   :  { %400 = vmatpush3.bf16.msra.mxu0 %v397_v19  ;;  %412 = vmatpush3.bf16.msra.mxu1 %v397_v19 }
  0x42   :  { %360 = vmatmul.mubr.msk.f32.vlgmr.msra.gmra.mrb[0].mxu0 %vm67_vm0, %v56_v20  ;;  %369 = vmatmul.mubr.msk.f32.vlgmr.msra.gmra.mrb[0].mxu1 %vm67_vm0, %v62_v21 }
  0x43   :  { %362 = vmatprep.mubr.msk.f32.mxu0 %vm67_vm0, %v57_v22  ;;  %371 = vmatprep.mubr.msk.f32.mxu1 %vm67_vm0, %v63_v23 }
  0x46   :  { %363 = vmatmul.mubr.msk.f32.gmra.mrb[2].mxu0 %vm67_vm0, %v58_v24  ;;  %372 = vmatmul.mubr.msk.f32.gmra.mrb[2].mxu1 %vm67_vm0, %v64_v25 }
  0x47   :  { %365 = vmatprep.mubr.msk.f32.mxu0 %vm67_vm0, %v59_v26  ;;  %374 = vmatprep.mubr.msk.f32.mxu1 %vm67_vm0, %v65_v27 }
  0x4a   :  { %366 = vmatmul.mubr.msk.f32.gmra.mrb[4].mxu0 %vm67_vm0, %v60_v28  ;;  %375 = vmatmul.mubr.msk.f32.gmra.mrb[4].mxu1 %vm67_vm0, %v66_v29 }
 0x115   :  { %v361_v30 = vpop.f32.mrb[0].mxu0  ;;  %v370_v31 = vpop.f32.mrb[0].mxu1 }
 0x116   :  { %230 = vst [vmem:[#allocation7 + $0x8] sm:$0xff] %v361_v30  ;;  %v242_v32 = vsub.f32 %v573_v1, %v361_v30  ;;  %236 = vst [vmem:[#allocation7 + $0x38] sm:$0xff] %v370_v31  ;;  %v248_v33 = vsub.f32 %v50_v12, %v370_v31  ;;  %v170_v34 = vpop.f32.mrb[1].mxu0  ;;  %v200_v35 = vpop.f32.mrb[1].mxu1 }
 0x117   :  { %229 = vst [vmem:[#allocation7] sm:$0xff] %v170_v34  ;;  %v241_v36 = vsub.f32 %v571_v0, %v170_v34  ;;  %235 = vst [vmem:[#allocation7 + $0x30] sm:$0xff] %v200_v35  ;;  %v247_v37 = vsub.f32 %v589_v11, %v200_v35 }
 0x118   :  { %254 = vst [vmem:[#allocation8 + $0x8] sm:$0xff] %v242_v32  ;;  %260 = vst [vmem:[#allocation8 + $0x38] sm:$0xff] %v248_v33 }
 0x119   :  { %253 = vst [vmem:[#allocation8] sm:$0xff] %v241_v36  ;;  %259 = vst [vmem:[#allocation8 + $0x30] sm:$0xff] %v247_v37  ;;  %v364_v38 = vpop.f32.mrb[2].mxu0  ;;  %v373_v39 = vpop.f32.mrb[2].mxu1 }
 0x11a   :  { %232 = vst [vmem:[#allocation7 + $0x18] sm:$0xff] %v364_v38  ;;  %v244_v40 = vsub.f32 %v579_v4, %v364_v38  ;;  %238 = vst [vmem:[#allocation7 + $0x48] sm:$0xff] %v373_v39  ;;  %v250_v41 = vsub.f32 %v596_v15, %v373_v39  ;;  %v180_v42 = vpop.f32.mrb[3].mxu0  ;;  %v210_v43 = vpop.f32.mrb[3].mxu1 }
 0x11b   :  { %231 = vst [vmem:[#allocation7 + $0x10] sm:$0xff] %v180_v42  ;;  %v243_v44 = vsub.f32 %v575_v2, %v180_v42  ;;  %237 = vst [vmem:[#allocation7 + $0x40] sm:$0xff] %v210_v43  ;;  %v249_v45 = vsub.f32 %v594_v14, %v210_v43 }
 0x11c   :  { %256 = vst [vmem:[#allocation8 + $0x18] sm:$0xff] %v244_v40  ;;  %262 = vst [vmem:[#allocation8 + $0x48] sm:$0xff] %v250_v41 }
 0x11d   :  { %255 = vst [vmem:[#allocation8 + $0x10] sm:$0xff] %v243_v44  ;;  %261 = vst [vmem:[#allocation8 + $0x40] sm:$0xff] %v249_v45  ;;  %v367_v46 = vpop.f32.mrb[4].mxu0  ;;  %v376_v47 = vpop.f32.mrb[4].mxu1 }
 0x11e   :  { %234 = vst [vmem:[#allocation7 + $0x28] sm:$0xff] %v367_v46  ;;  %v246_v48 = vsub.f32 %v585_v7, %v367_v46  ;;  %240 = vst [vmem:[#allocation7 + $0x58] sm:$0xff] %v376_v47  ;;  %v252_v49 = vsub.f32 %v602_v18, %v376_v47  ;;  %v190_v50 = vpop.f32.mrb[5].mxu0  ;;  %v220_v51 = vpop.f32.mrb[5].mxu1 }
 0x11f   :  { %233 = vst [vmem:[#allocation7 + $0x20] sm:$0xff] %v190_v50  ;;  %v245_v52 = vsub.f32 %v583_v6, %v190_v50  ;;  %239 = vst [vmem:[#allocation7 + $0x50] sm:$0xff] %v220_v51  ;;  %v251_v53 = vsub.f32 %v600_v17, %v220_v51 }
 0x120   :  { %258 = vst [vmem:[#allocation8 + $0x28] sm:$0xff] %v246_v48  ;;  %264 = vst [vmem:[#allocation8 + $0x58] sm:$0xff] %v252_v49 }
 0x121   :  { %474 = shalt.err (!%p471_p6)
}
 0x122   :  { %s475_s16 = scalar_lea.hbm %s673_s2, 1536 }
 0x123   :  { %p476_p7 = scmp.ne.s32.totalorder %s673_s2, %s475_s16  ;;  %p479_p8 = scmp.lt.u32.totalorder %s475_s16, %s673_s2 }
 0x125   :  { %p481_p9 = pnand %p479_p8, %p476_p7 }
 0x127   :  { %484 = shalt.err (!%p481_p9)
}
 0x128   :  { %276 = dma.vmem_to_hbm [thread:$0]  %s623_s10, 1536, %s673_s2, [#allocation4], %s516_s22, %s516_s22, %s517_s23   ;;  %257 = vst [vmem:[#allocation8 + $0x20] sm:$0xff] %v245_v52  ;;  %263 = vst [vmem:[#allocation8 + $0x50] sm:$0xff] %v251_v53 }
 0x129   :  { %s485_s25 = scalar_lea.vmem %s629_s12, 1536  ;;  %p490_p11 = scmp.lt.s32.totalorder %s629_s12, %s629_s12 }
 0x12a   :  { %p486_p10 = scmp.ne.s32.totalorder %s629_s12, %s485_s25  ;;  %p491_p12 = scmp.lt.s32.totalorder %s485_s25, %s485_s25 }
 0x12c   :  { %p492_p13 = por %p491_p12, %p490_p11 }
 0x12e   :  { %p493_p0 = pnand %p492_p13, %p486_p10 }
 0x130   :  { %496 = shalt.err (!%p493_p0)
}
 0x131   :  { %s497_s28 = scalar_lea.hbm %s674_s3, 1536 }
 0x132   :  { %p498_p1 = scmp.ne.s32.totalorder %s674_s3, %s497_s28  ;;  %p501_p2 = scmp.lt.u32.totalorder %s497_s28, %s674_s3 }
 0x134   :  { %p503_p3 = pnand %p501_p2, %p498_p1 }
 0x136   :  { %506 = shalt.err (!%p503_p3)
}
 0x137   :  { %288 = dma.vmem_to_hbm [thread:$0]  %s629_s12, 1536, %s674_s3, [#allocation9], %s516_s22, %s516_s22, %s517_s23  }
 0x138   :  { %511 = dma.done.wait [#allocation4], 1536  }
 0x139   :  { %512 = vsyncadd [#allocation4], 4294965760 }
 0x13a   :  { %513 = dma.done.wait [#allocation9], 1536  }
 0x13b   :  { %514 = vsyncadd [#allocation9], 4294965760 }
 0x13c   :  { %295 = vsyncpa [#allocation3], 1 }
 0x13d   :  { %296 = vsyncpa [#allocation6], 1 }
 0x13e   :  { %297 = vsyncpa [#allocation4], 1 }
 0x13f   :  { %298 = vsyncpa [#allocation9], 1 }

</bundles_post_ra>
